<compile_context>
chip_gen: v5e
topology: v5e:2x2
jax: 0.10.0
libtpu: 0.0.40
codegen_flags: <defaults>
</compile_context>

<pallas_src>
import jax
import jax.numpy as jnp
from jax import lax
from jax.experimental import pallas as pl
from jax.experimental.pallas import tpu as pltpu


# ----------------------------------------------------------------------------
# Fused kernel: L x (hetero-GCN ⊕ fc ⊕ relu ⊕ BN) -> VQ lookup -> per-graph mean.
# All operands (~60 KiB at these sizes) are VMEM-resident; grid is a single step.
# TODO(synk): for large N, switch to a row-tiled grid over A_cat / h
#             (tile 256-512 rows, dimension_semantics=("parallel",)).
# ----------------------------------------------------------------------------
def make_encoder_kernel(num_layers, n_nodes, hidden):
    N, H = n_nodes, hidden

    def kernel(*refs):
        a_ref = refs[0]                        # (N, 3N)  bf16 hstacked normalized adjacencies
        x_ref = refs[1]                        # (N, Din0) f32 node features
        w_refs = refs[2:2 + num_layers]        # each (3, Din_l, H) bf16 folded W_r @ Wfc
        vec_ref = refs[2 + num_layers]         # (3L, H) f32 packed [b', scale, shift] per layer
        et_ref = refs[3 + num_layers]          # (H, K)  f32 codebook, transposed
        e_ref = refs[4 + num_layers]           # (K, H)  f32 codebook
        esq_ref = refs[5 + num_layers]         # (1, K)  f32 per-entry squared norms
        m_ref = refs[6 + num_layers]           # (G, N)  f32 mean-nodes membership matrix
        o_ref = refs[7 + num_layers]           # (G, 2H) output
        xw_ref = refs[8 + num_layers]          # (3N, H) bf16 VMEM scratch for vstack_r(X @ W'_r)

        a_cat = a_ref[...]                     # (N, 3N) bf16
        vecs = vec_ref[...]                    # (3L, H) f32
        h = x_ref[...]                         # (N, Din0) f32

        for l in range(num_layers):            # static unroll over layers
            w = w_refs[l]
            b = vecs[3 * l:3 * l + 1, :]       # (1, H) folded bias (sum_r b_r)@Wfc + bfc
            scale = vecs[3 * l + 1:3 * l + 2, :]  # (1, H) BN-eval scale
            shift = vecs[3 * l + 2:3 * l + 3, :]  # (1, H) BN-eval shift

            # vstack_r(h @ W'_r) written straight into scratch (no concat copy).
            h_b = h.astype(jnp.bfloat16)
            for r in range(3):
                xw_ref[r * N:(r + 1) * N, :] = jnp.dot(
                    h_b, w[r], preferred_element_type=jnp.float32
                ).astype(jnp.bfloat16)

            # sum_r A_r @ (X @ W'_r) == [A_0|A_1|A_2] @ vstack_r(X @ W'_r): one big MXU matmul.
            y = jnp.dot(a_cat, xw_ref[...],
                        preferred_element_type=jnp.float32) + b          # (N, H)
            h = jnp.maximum(y, 0.0) * scale + shift                       # relu + BN(eval)
            # TODO(synk): nn.Dropout between layers is eval-mode identity here; a
            # training-mode mask would use pltpu.prng_seed / pltpu.prng_random_bits.
            # TODO(synk): pre-ReLU fold of the BN scale into W' is exact only when
            # scale > 0 elementwise; gated host-side, not applied here.

        # VQ: nearest codebook entry per node; ||h||^2 dropped (constant per row).
        scores = jnp.dot(h, et_ref[...], preferred_element_type=jnp.float32)  # (N, K)
        d = esq_ref[...] - 2.0 * scores                                        # (N, K)
        kk = e_ref.shape[0]
        dmin = jnp.min(d, axis=-1, keepdims=True)                              # (N, 1)
        col = lax.broadcasted_iota(jnp.int32, d.shape, 1)
        first = jnp.min(jnp.where(d <= dmin, col, kk), axis=-1, keepdims=True)  # torch argmin tie-break
        onehot = (col == first).astype(jnp.float32)                             # (N, K)

        # per-graph mean of cat([h, z]):  z-readout as (m @ onehot) @ E.
        m = m_ref[...]
        mh = jnp.dot(m, h, preferred_element_type=jnp.float32)                 # (G, H)
        mz = jnp.dot(jnp.dot(m, onehot, preferred_element_type=jnp.float32),
                     e_ref[...], preferred_element_type=jnp.float32)           # (G, H)
        o_ref[:, :H] = mh.astype(o_ref.dtype)
        o_ref[:, H:] = mz.astype(o_ref.dtype)

    return kernel


def encoder_fused(A_cat, x, w_folded, vecs, e_t, codebook, e_sq, M):
    N = x.shape[0]
    G = M.shape[0]
    H = codebook.shape[1]
    num_layers = len(w_folded)
    inputs = [A_cat, x, *w_folded, vecs, e_t, codebook, e_sq, M]
    vmem = pl.BlockSpec(memory_space=pltpu.MemorySpace.VMEM)
    return pl.pallas_call(
        make_encoder_kernel(num_layers, N, H),
        out_shape=jax.ShapeDtypeStruct((G, 2 * H), jnp.float32),
        in_specs=[vmem] * len(inputs),
        out_specs=vmem,
        scratch_shapes=[pltpu.VMEM((3 * N, H), jnp.bfloat16)],
        # Explicit VMEM budget (well within the 32 MiB scoped default on every
        # generation, and within v7x's 64 MiB physical VMEM).
        compiler_params=pltpu.CompilerParams(vmem_limit_bytes=32 * 1024 * 1024),
    )(*inputs)


# ----------------------------------------------------------------------------
# Host-side wrapper: exact algebraic folding of fc and BatchNorm into per-layer
# (W'_r bf16, packed [b', scale, shift]), adjacency laid out as [A_0 | A_1 | A_2] bf16,
# codebook squared-norms and transpose precomputed.
# ----------------------------------------------------------------------------
@jax.jit
def gcn_encoder_forward(x, A, M, codebook, layers):
    A_cat = jnp.concatenate([A[0], A[1], A[2]], axis=1).astype(jnp.bfloat16)  # (N, 3N)
    w_folded = []
    vec_rows = []
    for p in layers:
        w_fold = jnp.einsum('rdh,hk->rdk', p['Wc'], p['Wfc'])            # W'_r = W_r @ Wfc
        b_fold = p['b_sum'] @ p['Wfc'] + p['bfc']                        # (1, H)
        scale = p['gamma'] * lax.rsqrt(p['rvar'] + 1e-5)                 # BN eval fold
        shift = p['beta'] - p['rmean'] * scale
        w_folded.append(w_fold.astype(jnp.bfloat16))
        vec_rows += [b_fold, scale, shift]
    vecs = jnp.concatenate(vec_rows, axis=0)                             # (3L, H) f32
    e_t = codebook.T                                                     # (H, K)
    e_sq = jnp.sum(codebook * codebook, axis=1, keepdims=True).T         # (1, K)
    return encoder_fused(A_cat, x, w_folded, vecs, e_t, codebook, e_sq, M)


# ----------------------------------------------------------------------------
# Glue: graph construction, DGL-style 'both' normalization, parameter init
# ----------------------------------------------------------------------------
def normalize_both(A):
    # A[i, j] = 1 if there is an edge j -> i.  GraphConv(norm='both'):
    # A_hat[i, j] = A[i, j] / sqrt(outdeg(j) * indeg(i)), zero degrees clamped to 1.
    indeg = jnp.maximum(A.sum(axis=1), 1.0)
    outdeg = jnp.maximum(A.sum(axis=0), 1.0)
    return A / jnp.sqrt(indeg)[:, None] / jnp.sqrt(outdeg)[None, :]


def build_graph(key, graph_sizes):
    N = int(sum(graph_sizes))
    keys = jax.random.split(key, 3)
    starts = [0]
    for s in graph_sizes[:-1]:
        starts.append(starts[-1] + s)
    block_mask = jnp.zeros((N, N), jnp.float32)
    for s0, sz in zip(starts, graph_sizes):
        block_mask = block_mask.at[s0:s0 + sz, s0:s0 + sz].set(1.0)

    adjs = []
    # SEQ relation: sequence chain (i <-> i+1) inside each graph (no wrap-around edge)
    chain = jnp.eye(N, k=1, dtype=jnp.float32) + jnp.eye(N, k=-1, dtype=jnp.float32)
    adjs.append(normalize_both(chain * block_mask))
    # STR_KNN / STR_DIS relations: random structural edges inside each graph
    for k in keys[1:]:
        rnd = (jax.random.uniform(k, (N, N)) < 0.15).astype(jnp.float32)
        adjs.append(normalize_both(rnd * block_mask))
    A = jnp.stack(adjs, axis=0)                                          # (3, N, N)

    # dgl.mean_nodes readout matrix
    G = len(graph_sizes)
    M = jnp.zeros((G, N), jnp.float32)
    for g, (s0, sz) in enumerate(zip(starts, graph_sizes)):
        M = M.at[g, s0:s0 + sz].set(1.0 / sz)
    return A, M


def init_params(key, param):
    H = param['prot_hidden_dim']
    L = param['prot_num_layers']
    Din0 = param['input_dim']
    layer_keys = jax.random.split(key, L)
    layers = []
    for l in range(L):
        din = Din0 if l == 0 else H
        ks = jax.random.split(layer_keys[l], 10)
        Wc = 0.2 * jax.random.normal(ks[0], (3, din, H), jnp.float32)
        # summed SEQ + STR_KNN + STR_DIS GraphConv biases
        b_sum = sum(0.05 * jax.random.normal(ks[1 + r], (1, H), jnp.float32)
                    for r in range(3))
        Wfc = 0.2 * jax.random.normal(ks[4], (H, H), jnp.float32)
        bfc = 0.05 * jax.random.normal(ks[5], (1, H), jnp.float32)
        gamma = 1.0 + 0.1 * jax.random.normal(ks[6], (1, H), jnp.float32)
        beta = 0.1 * jax.random.normal(ks[7], (1, H), jnp.float32)
        rmean = 0.1 * jax.random.normal(ks[8], (1, H), jnp.float32)
        rvar = 0.5 + jax.random.uniform(ks[9], (1, H), jnp.float32)
        layers.append(dict(Wc=Wc, b_sum=b_sum, Wfc=Wfc, bfc=bfc,
                           gamma=gamma, beta=beta, rmean=rmean, rvar=rvar))
    return layers


if __name__ == "__main__":
    param = dict(prot_num_layers=2, prot_hidden_dim=32, input_dim=16,
                 dropout_ratio=0.1)
    graph_sizes = (40, 24)      # batched graph of 2 proteins, 64 amino-acid nodes total
    N = sum(graph_sizes)
    K = 16                      # codebook size of the external vq_layer

    root = jax.random.PRNGKey(0)
    k_graph, k_feat, k_params, k_code = jax.random.split(root, 4)

    A, M = build_graph(k_graph, graph_sizes)                             # (3,N,N), (G,N)
    x = jax.random.normal(k_feat, (N, param['input_dim']), jnp.float32)
    layers = init_params(k_params, param)
    codebook = jax.random.normal(k_code, (K, param['prot_hidden_dim']), jnp.float32)

    prot_embed = jax.block_until_ready(
        gcn_encoder_forward(x, A, M, codebook, layers))

    assert prot_embed.shape == (len(graph_sizes), 2 * param['prot_hidden_dim'])
    assert bool(jnp.all(jnp.isfinite(prot_embed)))
    print("KERNEL_OK")
</pallas_src>

<mosaic_0001>
module attributes {stable_mosaic.version = 11 : i64} {
  func.func @kernel(%arg0: memref<64x192xbf16, #tpu.memory_space<vmem>>, %arg1: memref<64x16xf32, #tpu.memory_space<vmem>>, %arg2: memref<3x16x32xbf16, #tpu.memory_space<vmem>>, %arg3: memref<3x32x32xbf16, #tpu.memory_space<vmem>>, %arg4: memref<6x32xf32, #tpu.memory_space<vmem>>, %arg5: memref<32x16xf32, #tpu.memory_space<vmem>>, %arg6: memref<16x32xf32, #tpu.memory_space<vmem>>, %arg7: memref<1x16xf32, #tpu.memory_space<vmem>>, %arg8: memref<2x64xf32, #tpu.memory_space<vmem>>, %arg9: memref<2x64xf32, #tpu.memory_space<vmem>>, %arg10: memref<192x32xbf16, #tpu.memory_space<vmem>>) attributes {dimension_semantics = [], scalar_prefetch = 0 : i64, scratch_operands = 1 : i64, tpu.core_type = #tpu.core_type<tc>} {
    %c0 = arith.constant 0 : index
    %c0_0 = arith.constant 0 : index
    %0 = vector.load %arg0[%c0, %c0_0] : memref<64x192xbf16, #tpu.memory_space<vmem>>, vector<64x192xbf16>
    %c0_1 = arith.constant 0 : index
    %c0_2 = arith.constant 0 : index
    %1 = vector.load %arg4[%c0_1, %c0_2] : memref<6x32xf32, #tpu.memory_space<vmem>>, vector<6x32xf32>
    %c0_3 = arith.constant 0 : index
    %c0_4 = arith.constant 0 : index
    %2 = vector.load %arg1[%c0_3, %c0_4] : memref<64x16xf32, #tpu.memory_space<vmem>>, vector<64x16xf32>
    %3 = vector.extract_strided_slice %1 {offsets = [0, 0], sizes = [1, 32], strides = [1, 1]} : vector<6x32xf32> to vector<1x32xf32>
    %4 = vector.extract_strided_slice %1 {offsets = [1, 0], sizes = [1, 32], strides = [1, 1]} : vector<6x32xf32> to vector<1x32xf32>
    %5 = vector.extract_strided_slice %1 {offsets = [2, 0], sizes = [1, 32], strides = [1, 1]} : vector<6x32xf32> to vector<1x32xf32>
    %6 = arith.truncf %2 : vector<64x16xf32> to vector<64x16xbf16>
    %c0_5 = arith.constant 0 : index
    %c0_6 = arith.constant 0 : index
    %c0_7 = arith.constant 0 : index
    %7 = vector.load %arg2[%c0_5, %c0_6, %c0_7] : memref<3x16x32xbf16, #tpu.memory_space<vmem>>, vector<1x16x32xbf16>
    %8 = vector.shape_cast %7 : vector<1x16x32xbf16> to vector<16x32xbf16>
    %cst = arith.constant dense<0.000000e+00> : vector<64x32xf32>
    %9 = tpu.matmul %6, %8, %cst {dimension_numbers = #tpu.dot_dimension_numbers<[1], [0], [0], [1], [0, 0, 1, 1], [], []>} : vector<64x16xbf16>, vector<16x32xbf16>, vector<64x32xf32> -> vector<64x32xf32>
    %10 = arith.truncf %9 : vector<64x32xf32> to vector<64x32xbf16>
    %c0_8 = arith.constant 0 : index
    %c0_9 = arith.constant 0 : index
    %11 = vector.load %arg10[%c0_8, %c0_9] : memref<192x32xbf16, #tpu.memory_space<vmem>>, vector<64x32xbf16>
    tpu.vector_store %arg10[%c0_8, %c0_9], %10 {strides = array<i32>} : memref<192x32xbf16, #tpu.memory_space<vmem>>, vector<64x32xbf16>,
    %c1 = arith.constant 1 : index
    %c0_10 = arith.constant 0 : index
    %c0_11 = arith.constant 0 : index
    %12 = vector.load %arg2[%c1, %c0_10, %c0_11] : memref<3x16x32xbf16, #tpu.memory_space<vmem>>, vector<1x16x32xbf16>
    %13 = vector.shape_cast %12 : vector<1x16x32xbf16> to vector<16x32xbf16>
    %cst_12 = arith.constant dense<0.000000e+00> : vector<64x32xf32>
    %14 = tpu.matmul %6, %13, %cst_12 {dimension_numbers = #tpu.dot_dimension_numbers<[1], [0], [0], [1], [0, 0, 1, 1], [], []>} : vector<64x16xbf16>, vector<16x32xbf16>, vector<64x32xf32> -> vector<64x32xf32>
    %15 = arith.truncf %14 : vector<64x32xf32> to vector<64x32xbf16>
    %c64 = arith.constant 64 : index
    %c0_13 = arith.constant 0 : index
    %16 = vector.load %arg10[%c64, %c0_13] : memref<192x32xbf16, #tpu.memory_space<vmem>>, vector<64x32xbf16>
    tpu.vector_store %arg10[%c64, %c0_13], %15 {strides = array<i32>} : memref<192x32xbf16, #tpu.memory_space<vmem>>, vector<64x32xbf16>,
    %c2 = arith.constant 2 : index
    %c0_14 = arith.constant 0 : index
    %c0_15 = arith.constant 0 : index
    %17 = vector.load %arg2[%c2, %c0_14, %c0_15] : memref<3x16x32xbf16, #tpu.memory_space<vmem>>, vector<1x16x32xbf16>
    %18 = vector.shape_cast %17 : vector<1x16x32xbf16> to vector<16x32xbf16>
    %cst_16 = arith.constant dense<0.000000e+00> : vector<64x32xf32>
    %19 = tpu.matmul %6, %18, %cst_16 {dimension_numbers = #tpu.dot_dimension_numbers<[1], [0], [0], [1], [0, 0, 1, 1], [], []>} : vector<64x16xbf16>, vector<16x32xbf16>, vector<64x32xf32> -> vector<64x32xf32>
    %20 = arith.truncf %19 : vector<64x32xf32> to vector<64x32xbf16>
    %c128 = arith.constant 128 : index
    %c0_17 = arith.constant 0 : index
    %21 = vector.load %arg10[%c128, %c0_17] : memref<192x32xbf16, #tpu.memory_space<vmem>>, vector<64x32xbf16>
    tpu.vector_store %arg10[%c128, %c0_17], %20 {strides = array<i32>} : memref<192x32xbf16, #tpu.memory_space<vmem>>, vector<64x32xbf16>,
    %c0_18 = arith.constant 0 : index
    %c0_19 = arith.constant 0 : index
    %22 = vector.load %arg10[%c0_18, %c0_19] : memref<192x32xbf16, #tpu.memory_space<vmem>>, vector<192x32xbf16>
    %cst_20 = arith.constant dense<0.000000e+00> : vector<64x32xf32>
    %23 = tpu.matmul %0, %22, %cst_20 {dimension_numbers = #tpu.dot_dimension_numbers<[1], [0], [0], [1], [0, 0, 1, 1], [], []>} : vector<64x192xbf16>, vector<192x32xbf16>, vector<64x32xf32> -> vector<64x32xf32>
    %24 = vector.broadcast %3 : vector<1x32xf32> to vector<64x32xf32>
    %25 = arith.addf %23, %24 : vector<64x32xf32>
    %cst_21 = arith.constant 0.000000e+00 : f32
    %26 = vector.broadcast %cst_21 : f32 to vector<64x32xf32>
    %27 = arith.maximumf %25, %26 : vector<64x32xf32>
    %28 = vector.broadcast %4 : vector<1x32xf32> to vector<64x32xf32>
    %29 = arith.mulf %27, %28 : vector<64x32xf32>
    %30 = vector.broadcast %5 : vector<1x32xf32> to vector<64x32xf32>
    %31 = arith.addf %29, %30 : vector<64x32xf32>
    %32 = vector.extract_strided_slice %1 {offsets = [3, 0], sizes = [1, 32], strides = [1, 1]} : vector<6x32xf32> to vector<1x32xf32>
    %33 = vector.extract_strided_slice %1 {offsets = [4, 0], sizes = [1, 32], strides = [1, 1]} : vector<6x32xf32> to vector<1x32xf32>
    %34 = vector.extract_strided_slice %1 {offsets = [5, 0], sizes = [1, 32], strides = [1, 1]} : vector<6x32xf32> to vector<1x32xf32>
    %35 = arith.truncf %31 : vector<64x32xf32> to vector<64x32xbf16>
    %c0_22 = arith.constant 0 : index
    %c0_23 = arith.constant 0 : index
    %c0_24 = arith.constant 0 : index
    %36 = vector.load %arg3[%c0_22, %c0_23, %c0_24] : memref<3x32x32xbf16, #tpu.memory_space<vmem>>, vector<1x32x32xbf16>
    %37 = vector.shape_cast %36 : vector<1x32x32xbf16> to vector<32x32xbf16>
    %cst_25 = arith.constant dense<0.000000e+00> : vector<64x32xf32>
    %38 = tpu.matmul %35, %37, %cst_25 {dimension_numbers = #tpu.dot_dimension_numbers<[1], [0], [0], [1], [0, 0, 1, 1], [], []>} : vector<64x32xbf16>, vector<32x32xbf16>, vector<64x32xf32> -> vector<64x32xf32>
    %39 = arith.truncf %38 : vector<64x32xf32> to vector<64x32xbf16>
    %c0_26 = arith.constant 0 : index
    %c0_27 = arith.constant 0 : index
    %40 = vector.load %arg10[%c0_26, %c0_27] : memref<192x32xbf16, #tpu.memory_space<vmem>>, vector<64x32xbf16>
    tpu.vector_store %arg10[%c0_26, %c0_27], %39 {strides = array<i32>} : memref<192x32xbf16, #tpu.memory_space<vmem>>, vector<64x32xbf16>,
    %c1_28 = arith.constant 1 : index
    %c0_29 = arith.constant 0 : index
    %c0_30 = arith.constant 0 : index
    %41 = vector.load %arg3[%c1_28, %c0_29, %c0_30] : memref<3x32x32xbf16, #tpu.memory_space<vmem>>, vector<1x32x32xbf16>
    %42 = vector.shape_cast %41 : vector<1x32x32xbf16> to vector<32x32xbf16>
    %cst_31 = arith.constant dense<0.000000e+00> : vector<64x32xf32>
    %43 = tpu.matmul %35, %42, %cst_31 {dimension_numbers = #tpu.dot_dimension_numbers<[1], [0], [0], [1], [0, 0, 1, 1], [], []>} : vector<64x32xbf16>, vector<32x32xbf16>, vector<64x32xf32> -> vector<64x32xf32>
    %44 = arith.truncf %43 : vector<64x32xf32> to vector<64x32xbf16>
    %c64_32 = arith.constant 64 : index
    %c0_33 = arith.constant 0 : index
    %45 = vector.load %arg10[%c64_32, %c0_33] : memref<192x32xbf16, #tpu.memory_space<vmem>>, vector<64x32xbf16>
    tpu.vector_store %arg10[%c64_32, %c0_33], %44 {strides = array<i32>} : memref<192x32xbf16, #tpu.memory_space<vmem>>, vector<64x32xbf16>,
    %c2_34 = arith.constant 2 : index
    %c0_35 = arith.constant 0 : index
    %c0_36 = arith.constant 0 : index
    %46 = vector.load %arg3[%c2_34, %c0_35, %c0_36] : memref<3x32x32xbf16, #tpu.memory_space<vmem>>, vector<1x32x32xbf16>
    %47 = vector.shape_cast %46 : vector<1x32x32xbf16> to vector<32x32xbf16>
    %cst_37 = arith.constant dense<0.000000e+00> : vector<64x32xf32>
    %48 = tpu.matmul %35, %47, %cst_37 {dimension_numbers = #tpu.dot_dimension_numbers<[1], [0], [0], [1], [0, 0, 1, 1], [], []>} : vector<64x32xbf16>, vector<32x32xbf16>, vector<64x32xf32> -> vector<64x32xf32>
    %49 = arith.truncf %48 : vector<64x32xf32> to vector<64x32xbf16>
    %c128_38 = arith.constant 128 : index
    %c0_39 = arith.constant 0 : index
    %50 = vector.load %arg10[%c128_38, %c0_39] : memref<192x32xbf16, #tpu.memory_space<vmem>>, vector<64x32xbf16>
    tpu.vector_store %arg10[%c128_38, %c0_39], %49 {strides = array<i32>} : memref<192x32xbf16, #tpu.memory_space<vmem>>, vector<64x32xbf16>,
    %c0_40 = arith.constant 0 : index
    %c0_41 = arith.constant 0 : index
    %51 = vector.load %arg10[%c0_40, %c0_41] : memref<192x32xbf16, #tpu.memory_space<vmem>>, vector<192x32xbf16>
    %cst_42 = arith.constant dense<0.000000e+00> : vector<64x32xf32>
    %52 = tpu.matmul %0, %51, %cst_42 {dimension_numbers = #tpu.dot_dimension_numbers<[1], [0], [0], [1], [0, 0, 1, 1], [], []>} : vector<64x192xbf16>, vector<192x32xbf16>, vector<64x32xf32> -> vector<64x32xf32>
    %53 = vector.broadcast %32 : vector<1x32xf32> to vector<64x32xf32>
    %54 = arith.addf %52, %53 : vector<64x32xf32>
    %cst_43 = arith.constant 0.000000e+00 : f32
    %55 = vector.broadcast %cst_43 : f32 to vector<64x32xf32>
    %56 = arith.maximumf %54, %55 : vector<64x32xf32>
    %57 = vector.broadcast %33 : vector<1x32xf32> to vector<64x32xf32>
    %58 = arith.mulf %56, %57 : vector<64x32xf32>
    %59 = vector.broadcast %34 : vector<1x32xf32> to vector<64x32xf32>
    %60 = arith.addf %58, %59 : vector<64x32xf32>
    %c0_44 = arith.constant 0 : index
    %c0_45 = arith.constant 0 : index
    %61 = vector.load %arg5[%c0_44, %c0_45] : memref<32x16xf32, #tpu.memory_space<vmem>>, vector<32x16xf32>
    %cst_46 = arith.constant dense<0.000000e+00> : vector<64x16xf32>
    %62 = tpu.matmul %60, %61, %cst_46 {dimension_numbers = #tpu.dot_dimension_numbers<[1], [0], [0], [1], [0, 0, 1, 1], [], []>} : vector<64x32xf32>, vector<32x16xf32>, vector<64x16xf32> -> vector<64x16xf32>
    %c0_47 = arith.constant 0 : index
    %c0_48 = arith.constant 0 : index
    %63 = vector.load %arg7[%c0_47, %c0_48] : memref<1x16xf32, #tpu.memory_space<vmem>>, vector<1x16xf32>
    %cst_49 = arith.constant 2.000000e+00 : f32
    %64 = vector.broadcast %cst_49 : f32 to vector<64x16xf32>
    %65 = arith.mulf %64, %62 : vector<64x16xf32>
    %66 = vector.broadcast %63 : vector<1x16xf32> to vector<64x16xf32>
    %67 = arith.subf %66, %65 : vector<64x16xf32>
    %cst_50 = arith.constant dense<0x7F800000> : vector<64xf32>
    %68 = vector.multi_reduction <minimumf>, %67, %cst_50 [1] : vector<64x16xf32> to vector<64xf32>
    %69 = vector.shape_cast %68 : vector<64xf32> to vector<64x1xf32>
    %70 = tpu.iota {dimensions = array<i32: 1>} : vector<64x16xi32>
    %71 = vector.broadcast %69 : vector<64x1xf32> to vector<64x16xf32>
    %72 = arith.cmpf ole, %67, %71 : vector<64x16xf32>
    %c16_i32 = arith.constant 16 : i32
    %73 = vector.broadcast %c16_i32 : i32 to vector<64x16xi32>
    %74 = arith.select %72, %70, %73 : vector<64x16xi1>, vector<64x16xi32>
    %cst_51 = arith.constant dense<2147483647> : vector<64xi32>
    %75 = vector.multi_reduction <minsi>, %74, %cst_51 [1] : vector<64x16xi32> to vector<64xi32>
    %76 = vector.shape_cast %75 : vector<64xi32> to vector<64x1xi32>
    %77 = vector.broadcast %76 : vector<64x1xi32> to vector<64x16xi32>
    %78 = arith.cmpi eq, %70, %77 : vector<64x16xi32>
    %79 = arith.extui %78 : vector<64x16xi1> to vector<64x16xi32>
    %80 = arith.sitofp %79 : vector<64x16xi32> to vector<64x16xf32>
    %c0_52 = arith.constant 0 : index
    %c0_53 = arith.constant 0 : index
    %81 = vector.load %arg8[%c0_52, %c0_53] : memref<2x64xf32, #tpu.memory_space<vmem>>, vector<2x64xf32>
    %cst_54 = arith.constant dense<0.000000e+00> : vector<2x32xf32>
    %82 = tpu.matmul %81, %60, %cst_54 {dimension_numbers = #tpu.dot_dimension_numbers<[1], [0], [0], [1], [0, 0, 1, 1], [], []>} : vector<2x64xf32>, vector<64x32xf32>, vector<2x32xf32> -> vector<2x32xf32>
    %cst_55 = arith.constant dense<0.000000e+00> : vector<2x16xf32>
    %83 = tpu.matmul %81, %80, %cst_55 {dimension_numbers = #tpu.dot_dimension_numbers<[1], [0], [0], [1], [0, 0, 1, 1], [], []>} : vector<2x64xf32>, vector<64x16xf32>, vector<2x16xf32> -> vector<2x16xf32>
    %c0_56 = arith.constant 0 : index
    %c0_57 = arith.constant 0 : index
    %84 = vector.load %arg6[%c0_56, %c0_57] : memref<16x32xf32, #tpu.memory_space<vmem>>, vector<16x32xf32>
    %cst_58 = arith.constant dense<0.000000e+00> : vector<2x32xf32>
    %85 = tpu.matmul %83, %84, %cst_58 {dimension_numbers = #tpu.dot_dimension_numbers<[1], [0], [0], [1], [0, 0, 1, 1], [], []>} : vector<2x16xf32>, vector<16x32xf32>, vector<2x32xf32> -> vector<2x32xf32>
    %c0_59 = arith.constant 0 : index
    %c0_60 = arith.constant 0 : index
    %86 = vector.load %arg9[%c0_59, %c0_60] : memref<2x64xf32, #tpu.memory_space<vmem>>, vector<2x32xf32>
    tpu.vector_store %arg9[%c0_59, %c0_60], %82 {strides = array<i32>} : memref<2x64xf32, #tpu.memory_space<vmem>>, vector<2x32xf32>,
    %c0_61 = arith.constant 0 : index
    %c32 = arith.constant 32 : index
    %87 = vector.load %arg9[%c0_61, %c32] : memref<2x64xf32, #tpu.memory_space<vmem>>, vector<2x32xf32>
    tpu.vector_store %arg9[%c0_61, %c32], %85 {strides = array<i32>} : memref<2x64xf32, #tpu.memory_space<vmem>>, vector<2x32xf32>,
    return
  }
}

</mosaic_0001>

<bundles_post_ra>
// kernel: gcn_encoder_forward.1
= control target key start
LH: loop header
LB: loop body
LE: loop exit
PB: predicated region body
PF: predicated region fallthrough
CT: control target
= control target key end

     0   :  { %vm63_vm0 = vcmask 130048   ;;  %s1890_s0 = inlined_call_operand.vmem [shape: bf16[64,192], index: 0, kind: input, shape index: {}]   ;;  %s1891_s1 = inlined_call_operand.vmem [shape: f32[64,16], index: 1, kind: input, shape index: {}]   ;;  %s1892_s2 = inlined_call_operand.vmem [shape: bf16[3,16,32], index: 2, kind: input, shape index: {}]   ;;  %s1893_s3 = inlined_call_operand.vmem [shape: bf16[3,32,32], index: 3, kind: input, shape index: {}]   ;;  %s1894_s4 = inlined_call_operand.vmem [shape: f32[6,32], index: 4, kind: input, shape index: {}]   ;;  %s1895_s5 = inlined_call_operand.vmem [shape: f32[32,16], index: 5, kind: input, shape index: {}]   ;;  %s1896_s6 = inlined_call_operand.vmem [shape: f32[16,32], index: 6, kind: input, shape index: {}]   ;;  %s1897_s7 = inlined_call_operand.vmem [shape: f32[1,16], index: 7, kind: input, shape index: {}]   ;;  %s1898_s8 = inlined_call_operand.vmem [shape: f32[2,64], index: 8, kind: input, shape index: {}]   ;;  %s1899_s9 = inlined_call_operand.hbm [shape: f32[2,64], index: 9, kind: output, shape index: {}]  }
   0x1   :  { %v1455_v0 = vld [vmem:[%s1892_s2 + $0x8] sm:$0xff]  ;;  %v1456_v1 = vld [vmem:[%s1892_s2 + $0x10] sm:$0xff]  ;;  %v43_v2 = vld [vmem:[%s1891_s1] sm:$0xff] }
   0x2   :  { %v44_v3 = vld [vmem:[%s1891_s1 + $0x8] sm:$0xff]  ;;  %v1454_v4 = vld [vmem:[%s1892_s2] sm:$0xff]  ;;  %138 = vmatpush.bf16.msra.mxu1 %v1455_v0  ;;  %192 = vmatpush.bf16.msra.mxu2 %v1456_v1 }
   0x3   :  { %v51_v5 = vpack.c.bf16 %v44_v3, %v43_v2  ;;  %83 = vmatpush.bf16.msra.mxu0 %v1454_v4 }
   0x4   :  { %14 = vsyncpa [#allocation4], 0  ;;  %v45_v6 = vld [vmem:[%s1891_s1 + $0x10] sm:$0xff]  ;;  %v46_v7 = vld [vmem:[%s1891_s1 + $0x18] sm:$0xff]  ;;  %vm113_vm1 = vcmask 257024   ;;  %vm363_vm2 = vcmask 523264  }
   0x5   :  { %1225 = vmatmul.msk.bf16.vlgmr.msra.gmra.mxu1 %vm63_vm0, %v51_v5  ;;  %1235 = vmatmul.msk.bf16.vlgmr.msra.gmra.mxu2 %vm63_vm0, %v51_v5  ;;  %v52_v8 = vpack.c.bf16 %v46_v7, %v45_v6  ;;  %v47_v9 = vld [vmem:[%s1891_s1 + $0x20] sm:$0xff]  ;;  %v48_v10 = vld [vmem:[%s1891_s1 + $0x28] sm:$0xff]  ;;  %v49_v12 = vld [vmem:[%s1891_s1 + $0x30] sm:$0xff]  ;;  %vm480_vm3 = vcmask 261120   ;;  %s1518_s18 = smov 32   ;;  %s1519_s19 = smov [#allocation3]  }
   0x6   :  { %1215 = vmatmul.msk.bf16.vlgmr.msra.gmra.mxu0 %vm63_vm0, %v51_v5  ;;  %v53_v11 = vpack.c.bf16 %v48_v10, %v47_v9  ;;  %v50_v13 = vld [vmem:[%s1891_s1 + $0x38] sm:$0xff]  ;;  %v1446_v7 = vld [vmem:[%s1890_s0 + $0x4] sm:$0xf]  ;;  %s1200_s20 = sshll.u32 %s1519_s19, 4  ;;  %s1202_s2 = sshll.u32 %s1899_s9, 4  ;;  %s1201_s20 = int_to_ptr.vmem [resolvable:$true] %s1200_s20  ;;  %s1203_s2 = int_to_ptr.hbm [resolvable:$true] %s1202_s2 }
   0x7   :  { %v54_v14 = vpack.c.bf16 %v50_v13, %v49_v12  ;;  %v1241_v13 = vld [vmem:[%s1890_s0] sm:$0xf] }
  0x15   :  { %1226 = vmatmul.msk.bf16.gmra.mxu1 %vm63_vm0, %v52_v8  ;;  %1236 = vmatmul.msk.bf16.gmra.mxu2 %vm63_vm0, %v52_v8 }
  0x16   :  { %1216 = vmatmul.msk.bf16.gmra.mxu0 %vm63_vm0, %v52_v8  ;;  %v1243_v8 = vld [vmem:[%s1890_s0 + $0x8] sm:$0xf0] }
  0x17   :  { %v1645_v10 = vor.u32 %v1446_v7, %v1243_v8 }
  0x25   :  { %1227 = vmatmul.msk.bf16.gmra.mxu1 %vm63_vm0, %v53_v11  ;;  %1237 = vmatmul.msk.bf16.gmra.mxu2 %vm63_vm0, %v53_v11 }
  0x26   :  { %1217 = vmatmul.msk.bf16.gmra.mxu0 %vm63_vm0, %v53_v11 }
  0x35   :  { %1228 = vmatmul.msk.bf16.gmra.mxu1 %vm63_vm0, %v54_v14  ;;  %1238 = vmatmul.msk.bf16.gmra.mxu2 %vm63_vm0, %v54_v14 }
  0x36   :  { %1218 = vmatmul.msk.bf16.gmra.mxu0 %vm63_vm0, %v54_v14  ;;  %v1447_v14 = vld [vmem:[%s1890_s0 + $0x4] sm:$0xf0] }
  0x82   :  { %v140_v15 = vpop.f32.mrf.mxu1 }
  0x83   :  { %v160_v16 = vpack.c.bf16 %v140_v15, %v140_v15  ;;  %v85_v17 = vpop.f32.mrf.mxu0 }
  0x84   :  { %v105_v18 = vpack.c.bf16 %v85_v17, %v85_v17  ;;  %v1448_v17 = vld [vmem:[%s1890_s0 + $0x14] sm:$0xf] }
  0x85   :  { %168 = vst.msk [vmem:[#allocation2 + $0x20] sm:$0xf] %vm113_vm1, %v160_v16  ;;  %v1655_v16 = vor.u32 %v1447_v14, %v1241_v13 }
  0x86   :  { %114 = vst.msk [vmem:[#allocation2] sm:$0xf] %vm113_vm1, %v105_v18  ;;  %v1251_v18 = vld [vmem:[%s1890_s0 + $0x18] sm:$0xf0] }
  0x88   :  { %v194_v19 = vpop.f32.mrf.mxu2 }
  0x89   :  { %v214_v20 = vpack.c.bf16 %v194_v19, %v194_v19  ;;  %v1664_v19 = vor.u32 %v1448_v17, %v1251_v18 }
  0x8a   :  { %v142_v21 = vpop.f32.mrf.mxu1 }
  0x8b   :  { %222 = vst.msk [vmem:[#allocation2 + $0x40] sm:$0xf] %vm113_vm1, %v214_v20  ;;  %v161_v22 = vpack.c.bf16 %v142_v21, %v142_v21  ;;  %v87_v23 = vpop.f32.mrf.mxu0  ;;  %v1249_v20 = vld [vmem:[%s1890_s0 + $0x10] sm:$0xf]  ;;  %v1449_v21 = vld [vmem:[%s1890_s0 + $0x14] sm:$0xf0] }
  0x8c   :  { %v106_v24 = vpack.c.bf16 %v87_v23, %v87_v23  ;;  %v1450_v23 = vld [vmem:[%s1890_s0 + $0x24] sm:$0xf] }
  0x8d   :  { %169 = vst.msk [vmem:[#allocation2 + $0x24] sm:$0xf] %vm113_vm1, %v161_v22  ;;  %v1674_v22 = vor.u32 %v1449_v21, %v1249_v20 }
  0x8e   :  { %115 = vst.msk [vmem:[#allocation2 + $0x4] sm:$0xf] %vm113_vm1, %v106_v24  ;;  %v1259_v24 = vld [vmem:[%s1890_s0 + $0x28] sm:$0xf0] }
  0x90   :  { %v196_v25 = vpop.f32.mrf.mxu2 }
  0x91   :  { %v215_v26 = vpack.c.bf16 %v196_v25, %v196_v25  ;;  %v1472_v25 = vld [vmem:[%s1893_s3 + $0x18] sm:$0xff] }
  0x92   :  { %v145_v27 = vpop.f32.mrf.mxu1  ;;  %561 = vmatpush.bf16.msrb.mxu2 %v1472_v25 }
  0x93   :  { %223 = vst.msk [vmem:[#allocation2 + $0x44] sm:$0xf] %vm113_vm1, %v215_v26  ;;  %v162_v28 = vpack.c.bf16 %v145_v27, %v145_v27  ;;  %v90_v29 = vpop.f32.mrf.mxu0  ;;  %v1686_v26 = vor.u32 %v1450_v23, %v1259_v24  ;;  %v1257_v27 = vld [vmem:[%s1890_s0 + $0x20] sm:$0xf] }
  0x94   :  { %v107_v30 = vpack.c.bf16 %v90_v29, %v90_v29  ;;  %v1461_v4 = vld [vmem:[#allocation2 + $0x20] sm:$0xff] }
  0x95   :  { %170 = vst.msk [vmem:[#allocation2 + $0x28] sm:$0xf] %vm113_vm1, %v162_v28  ;;  %v1457_v15 = vld [vmem:[#allocation2] sm:$0xff]  ;;  %v1451_v28 = vld [vmem:[%s1890_s0 + $0x24] sm:$0xf0] }
  0x96   :  { %116 = vst.msk [vmem:[#allocation2 + $0x8] sm:$0xf] %vm113_vm1, %v107_v30  ;;  %v1696_v29 = vor.u32 %v1451_v28, %v1257_v27  ;;  %v1452_v30 = vld [vmem:[%s1890_s0 + $0x34] sm:$0xf] }
  0x98   :  { %v199_v31 = vpop.f32.mrf.mxu2 }
  0x99   :  { %v216_v32 = vpack.c.bf16 %v199_v31, %v199_v31  ;;  %v1267_v31 = vld [vmem:[%s1890_s0 + $0x38] sm:$0xf0] }
  0x9a   :  { %v147_v33 = vpop.f32.mrf.mxu1  ;;  %v1465_v9 = vld [vmem:[#allocation2 + $0x40] sm:$0xff] }
  0x9b   :  { %224 = vst.msk [vmem:[#allocation2 + $0x48] sm:$0xf] %vm113_vm1, %v216_v32  ;;  %v163_v34 = vpack.c.bf16 %v147_v33, %v147_v33  ;;  %v92_v35 = vpop.f32.mrf.mxu0  ;;  %v1705_v32 = vor.u32 %v1452_v30, %v1267_v31  ;;  %v1265_v33 = vld [vmem:[%s1890_s0 + $0x30] sm:$0xf] }
  0x9c   :  { %v108_v36 = vpack.c.bf16 %v92_v35, %v92_v35 }
  0x9d   :  { %171 = vst.msk [vmem:[#allocation2 + $0x2c] sm:$0xf] %vm113_vm1, %v163_v34  ;;  %v1453_v34 = vld [vmem:[%s1890_s0 + $0x34] sm:$0xf0] }
  0x9e   :  { %117 = vst.msk [vmem:[#allocation2 + $0xc] sm:$0xf] %vm113_vm1, %v108_v36  ;;  %v1715_v35 = vor.u32 %v1453_v34, %v1265_v33  ;;  %v1474_v36 = vld [vmem:[%s1893_s3 + $0x28] sm:$0xff] }
  0xa0   :  { %v201_v37 = vpop.f32.mrf.mxu2 }
  0xa1   :  { %v217_v38 = vpack.c.bf16 %v201_v37, %v201_v37  ;;  %v1470_v37 = vld [vmem:[%s1893_s3 + $0x8] sm:$0xff] }
  0xa2   :  { %v150_v39 = vpop.f32.mrf.mxu1  ;;  %499 = vmatpush.bf16.msrb.mxu1 %v1470_v37 }
  0xa3   :  { %225 = vst.msk [vmem:[#allocation2 + $0x4c] sm:$0xf] %vm113_vm1, %v217_v38  ;;  %v164_v40 = vpack.c.bf16 %v150_v39, %v150_v39  ;;  %v95_v41 = vpop.f32.mrf.mxu0  ;;  %v1469_v38 = vld [vmem:[%s1893_s3] sm:$0xff]  ;;  %v1471_v39 = vld [vmem:[%s1893_s3 + $0x10] sm:$0xff] }
  0xa4   :  { %v109_v42 = vpack.c.bf16 %v95_v41, %v95_v41  ;;  %v1462_v2 = vld [vmem:[#allocation2 + $0x28] sm:$0xff]  ;;  %562 = vmatpush.bf16.msrb.mxu2 %v1471_v39 }
  0xa5   :  { %172 = vst.msk [vmem:[#allocation2 + $0x30] sm:$0xf] %vm113_vm1, %v164_v40  ;;  %v1458_v12 = vld [vmem:[#allocation2 + $0x8] sm:$0xff]  ;;  %v1473_v40 = vld [vmem:[%s1893_s3 + $0x20] sm:$0xff] }
  0xa6   :  { %118 = vst.msk [vmem:[#allocation2 + $0x10] sm:$0xf] %vm113_vm1, %v109_v42  ;;  %500 = vmatpush.bf16.msrb.mxu1 %v1469_v38  ;;  %v1736_v42 = vld [vmem:[%s1894_s4] sm:$0x3f] }
  0xa8   :  { %v204_v43 = vpop.f32.mrf.mxu2 }
  0xa9   :  { %v218_v44 = vpack.c.bf16 %v204_v43, %v204_v43  ;;  %v1739_v43 = vperm.slane %v1736_v42, 0 }
  0xaa   :  { %v152_v45 = vpop.f32.mrf.mxu1  ;;  %v1466_v5 = vld [vmem:[#allocation2 + $0x48] sm:$0xff] }
  0xab   :  { %226 = vst.msk [vmem:[#allocation2 + $0x50] sm:$0xf] %vm113_vm1, %v218_v44  ;;  %v165_v46 = vpack.c.bf16 %v152_v45, %v152_v45  ;;  %v97_v47 = vpop.f32.mrf.mxu0 }
  0xac   :  { %v110_v48 = vpack.c.bf16 %v97_v47, %v97_v47 }
  0xad   :  { %173 = vst.msk [vmem:[#allocation2 + $0x34] sm:$0xf] %vm113_vm1, %v165_v46 }
  0xae   :  { %119 = vst.msk [vmem:[#allocation2 + $0x14] sm:$0xf] %vm113_vm1, %v110_v48 }
  0xb0   :  { %v206_v49 = vpop.f32.mrf.mxu2 }
  0xb1   :  { %v219_v50 = vpack.c.bf16 %v206_v49, %v206_v49 }
  0xb2   :  { %v155_v51 = vpop.f32.mrf.mxu1 }
  0xb3   :  { %227 = vst.msk [vmem:[#allocation2 + $0x54] sm:$0xf] %vm113_vm1, %v219_v50  ;;  %v166_v52 = vpack.c.bf16 %v155_v51, %v155_v51  ;;  %v100_v53 = vpop.f32.mrf.mxu0  ;;  %v442_v51 = vperm.slane %v1736_v42, 1 }
  0xb4   :  { %v111_v54 = vpack.c.bf16 %v100_v53, %v100_v53  ;;  %v1463_v0 = vld [vmem:[#allocation2 + $0x30] sm:$0xff] }
  0xb5   :  { %174 = vst.msk [vmem:[#allocation2 + $0x38] sm:$0xf] %vm113_vm1, %v166_v52  ;;  %v1459_v11 = vld [vmem:[#allocation2 + $0x10] sm:$0xff] }
  0xb6   :  { %120 = vst.msk [vmem:[#allocation2 + $0x18] sm:$0xf] %vm113_vm1, %v111_v54 }
  0xb8   :  { %v209_v55 = vpop.f32.mrf.mxu2 }
  0xb9   :  { %v220_v56 = vpack.c.bf16 %v209_v55, %v209_v55  ;;  %v451_v55 = vperm.slane %v1736_v42, 2 }
  0xba   :  { %v157_v57 = vpop.f32.mrf.mxu1  ;;  %v1467_v3 = vld [vmem:[#allocation2 + $0x50] sm:$0xff] }
  0xbb   :  { %228 = vst.msk [vmem:[#allocation2 + $0x58] sm:$0xf] %vm113_vm1, %v220_v56  ;;  %v167_v58 = vpack.c.bf16 %v157_v57, %v157_v57  ;;  %v102_v59 = vpop.f32.mrf.mxu0 }
  0xbc   :  { %v112_v60 = vpack.c.bf16 %v102_v59, %v102_v59 }
  0xbd   :  { %175 = vst.msk [vmem:[#allocation2 + $0x3c] sm:$0xf] %vm113_vm1, %v167_v58 }
  0xbe   :  { %121 = vst.msk [vmem:[#allocation2 + $0x1c] sm:$0xf] %vm113_vm1, %v112_v60 }
  0xc0   :  { %v211_v61 = vpop.f32.mrf.mxu2 }
  0xc1   :  { %v221_v62 = vpack.c.bf16 %v211_v61, %v211_v61 }
  0xc3   :  { %229 = vst.msk [vmem:[#allocation2 + $0x5c] sm:$0xf] %vm113_vm1, %v221_v62 }
  0xc4   :  { %v1464_v63 = vld [vmem:[#allocation2 + $0x38] sm:$0xff] }
  0xc5   :  { %376 = vmatpush.bf16.msra.mxu3 %v1464_v63  ;;  %v1460_v6 = vld [vmem:[#allocation2 + $0x18] sm:$0xff] }
  0xc9   :  { %377 = vmatpush.bf16.msra.mxu3 %v1463_v0 }
  0xca   :  { %v1468_v1 = vld [vmem:[#allocation2 + $0x58] sm:$0xff] }
  0xcb   :  { %409 = vmatpush.bf16.msrb.mxu0 %v1468_v1 }
  0xcd   :  { %378 = vmatpush.bf16.msra.mxu3 %v1462_v2 }
  0xcf   :  { %410 = vmatpush.bf16.msrb.mxu0 %v1467_v3 }
  0xd1   :  { %379 = vmatpush.bf16.msra.mxu3 %v1461_v4 }
  0xd3   :  { %411 = vmatpush.bf16.msrb.mxu0 %v1466_v5 }
  0xd5   :  { %380 = vmatpush.bf16.msra.mxu3 %v1460_v6 }
  0xd7   :  { %412 = vmatpush.bf16.msrb.mxu0 %v1465_v9 }
  0xd9   :  { %381 = vmatpush.bf16.msra.mxu3 %v1459_v11 }
  0xda   :  { %1319 = vmatmul.msk.bf16.vlgmr.msrb.gmra.mxu0 %vm363_vm2, %v1645_v10 }
  0xdd   :  { %382 = vmatpush.bf16.msra.mxu3 %v1458_v12 }
  0xe1   :  { %383 = vmatpush.bf16.msra.mxu3 %v1457_v15 }
  0xe4   :  { %384 = vmatmul.bf16.vlgmr.msra.gmra.mxu3 %v1655_v16 }
  0xe5   :  { %623 = vmatpush.bf16.msrb.mxu3 %v1474_v36 }
  0xe9   :  { %624 = vmatpush.bf16.msrb.mxu3 %v1473_v40 }
  0xea   :  { %1320 = vmatmul.msk.bf16.gmra.mxu0 %vm363_vm2, %v1664_v19 }
  0xf4   :  { %389 = vmatmul.bf16.gmra.mxu3 %v1674_v22 }
  0xfa   :  { %1321 = vmatmul.msk.bf16.gmra.mxu0 %vm363_vm2, %v1686_v26 }
 0x104   :  { %394 = vmatmul.bf16.gmra.mxu3 %v1696_v29 }
 0x10a   :  { %1322 = vmatmul.msk.bf16.gmra.mxu0 %vm363_vm2, %v1705_v32 }
 0x114   :  { %399 = vmatmul.bf16.gmra.mxu3 %v1715_v35 }
 0x157   :  { %v414_v41 = vpop.f32.mrf.mxu0 }
 0x15f   :  { %v416_v44 = vpop.f32.mrf.mxu0 }
 0x167   :  { %v385_v45 = vpop.f32.mrf.mxu3  ;;  %v419_v49 = vpop.f32.mrf.mxu0 }
 0x168   :  { %v386_v46 = vadd.f32 %v385_v45, %v1739_v43 }
 0x16a   :  { %v415_v47 = vadd.f32 %v414_v41, %v386_v46 }
 0x16c   :  { %v434_v50 = vmax.f32 %v415_v47, 0.0 }
 0x16e   :  { %v443_v54 = vmul.f32 %v442_v51, %v434_v50 }
 0x16f   :  { %v387_v48 = vpop.f32.mrf.mxu3  ;;  %v421_v62 = vpop.f32.mrf.mxu0 }
 0x170   :  { %v388_v52 = vadd.f32 %v387_v48, %v1739_v43  ;;  %v452_v59 = vadd.f32 %v451_v55, %v443_v54 }
 0x172   :  { %v417_v53 = vadd.f32 %v416_v44, %v388_v52 }
 0x174   :  { %v435_v56 = vmax.f32 %v417_v53, 0.0 }
 0x176   :  { %v444_v57 = vmul.f32 %v442_v51, %v435_v56 }
 0x177   :  { %v390_v58 = vpop.f32.mrf.mxu3  ;;  %v424_v5 = vpop.f32.mrf.mxu0 }
 0x178   :  { %v453_v60 = vadd.f32 %v451_v55, %v444_v57  ;;  %v391_v61 = vadd.f32 %v390_v58, %v1739_v43 }
 0x17a   :  { %v460_v63 = vpack.c.bf16 %v453_v60, %v452_v59  ;;  %v420_v0 = vadd.f32 %v419_v49, %v391_v61 }
 0x17c   :  { %1331 = vmatmul.msk.bf16.vlgmr.msrb.gmra.mxu1 %vm480_vm3, %v460_v63  ;;  %1347 = vmatmul.msk.bf16.vlgmr.msrb.gmra.mxu2 %vm480_vm3, %v460_v63  ;;  %v436_v2 = vmax.f32 %v420_v0, 0.0 }
 0x17d   :  { %1363 = vmatmul.msk.bf16.vlgmr.msrb.gmra.mxu3 %vm480_vm3, %v460_v63 }
 0x17e   :  { %v445_v6 = vmul.f32 %v442_v51, %v436_v2 }
 0x17f   :  { %v392_v1 = vpop.f32.mrf.mxu3  ;;  %v426_v17 = vpop.f32.mrf.mxu0 }
 0x180   :  { %v393_v3 = vadd.f32 %v392_v1, %v1739_v43  ;;  %v454_v12 = vadd.f32 %v451_v55, %v445_v6 }
 0x182   :  { %v422_v4 = vadd.f32 %v421_v62, %v393_v3 }
 0x184   :  { %v437_v7 = vmax.f32 %v422_v4, 0.0 }
 0x186   :  { %v446_v8 = vmul.f32 %v442_v51, %v437_v7 }
 0x187   :  { %v395_v9 = vpop.f32.mrf.mxu3  ;;  %v429_v28 = vpop.f32.mrf.mxu0 }
 0x188   :  { %v396_v11 = vadd.f32 %v395_v9, %v1739_v43  ;;  %v455_v13 = vadd.f32 %v451_v55, %v446_v8 }
 0x18a   :  { %v461_v14 = vpack.c.bf16 %v455_v13, %v454_v12  ;;  %v425_v15 = vadd.f32 %v424_v5, %v396_v11 }
 0x18c   :  { %1332 = vmatmul.msk.bf16.gmra.mxu1 %vm480_vm3, %v461_v14  ;;  %1348 = vmatmul.msk.bf16.gmra.mxu2 %vm480_vm3, %v461_v14  ;;  %v438_v20 = vmax.f32 %v425_v15, 0.0 }
 0x18d   :  { %1364 = vmatmul.msk.bf16.gmra.mxu3 %vm480_vm3, %v461_v14 }
 0x18e   :  { %v447_v24 = vmul.f32 %v442_v51, %v438_v20 }
 0x18f   :  { %v397_v18 = vpop.f32.mrf.mxu3  ;;  %v431_v41 = vpop.f32.mrf.mxu0 }
 0x190   :  { %v398_v21 = vadd.f32 %v397_v18, %v1739_v43  ;;  %v456_v33 = vadd.f32 %v451_v55, %v447_v24 }
 0x192   :  { %v427_v23 = vadd.f32 %v426_v17, %v398_v21 }
 0x194   :  { %v439_v25 = vmax.f32 %v427_v23, 0.0 }
 0x196   :  { %v448_v27 = vmul.f32 %v442_v51, %v439_v25 }
 0x197   :  { %v400_v30 = vpop.f32.mrf.mxu3 }
 0x198   :  { %v401_v31 = vadd.f32 %v400_v30, %v1739_v43  ;;  %v457_v34 = vadd.f32 %v451_v55, %v448_v27 }
 0x19a   :  { %v462_v36 = vpack.c.bf16 %v457_v34, %v456_v33  ;;  %v430_v37 = vadd.f32 %v429_v28, %v401_v31 }
 0x19c   :  { %1333 = vmatmul.msk.bf16.gmra.mxu1 %vm480_vm3, %v462_v36  ;;  %1349 = vmatmul.msk.bf16.gmra.mxu2 %vm480_vm3, %v462_v36  ;;  %v440_v39 = vmax.f32 %v430_v37, 0.0 }
 0x19d   :  { %1365 = vmatmul.msk.bf16.gmra.mxu3 %vm480_vm3, %v462_v36 }
 0x19e   :  { %v449_v45 = vmul.f32 %v442_v51, %v440_v39 }
 0x19f   :  { %v402_v38 = vpop.f32.mrf.mxu3 }
 0x1a0   :  { %v403_v40 = vadd.f32 %v402_v38, %v1739_v43  ;;  %v458_v48 = vadd.f32 %v451_v55, %v449_v45 }
 0x1a2   :  { %v432_v44 = vadd.f32 %v431_v41, %v403_v40 }
 0x1a4   :  { %v441_v46 = vmax.f32 %v432_v44, 0.0 }
 0x1a6   :  { %v450_v47 = vmul.f32 %v442_v51, %v441_v46 }
 0x1a8   :  { %v459_v49 = vadd.f32 %v451_v55, %v450_v47 }
 0x1aa   :  { %v463_v50 = vpack.c.bf16 %v459_v49, %v458_v48 }
 0x1ac   :  { %1334 = vmatmul.msk.bf16.gmra.mxu1 %vm480_vm3, %v463_v50  ;;  %1350 = vmatmul.msk.bf16.gmra.mxu2 %vm480_vm3, %v463_v50 }
 0x1ad   :  { %1366 = vmatmul.msk.bf16.gmra.mxu3 %vm480_vm3, %v463_v50 }
 0x1f9   :  { %v502_v52 = vpop.f32.mrf.mxu1 }
 0x1fa   :  { %v522_v53 = vpack.c.bf16 %v502_v52, %v502_v52 }
 0x1fc   :  { %530 = vst.msk [vmem:[#allocation2] sm:$0xf] %vm113_vm1, %v522_v53 }
 0x1ff   :  { %v564_v54 = vpop.f32.mrf.mxu2 }
 0x200   :  { %v584_v43 = vpack.c.bf16 %v564_v54, %v564_v54  ;;  %v626_v56 = vpop.f32.mrf.mxu3 }
 0x201   :  { %v646_v57 = vpack.c.bf16 %v626_v56, %v626_v56  ;;  %v504_v58 = vpop.f32.mrf.mxu1 }
 0x202   :  { %592 = vst.msk [vmem:[#allocation2 + $0x20] sm:$0xf] %vm113_vm1, %v584_v43  ;;  %v523_v51 = vpack.c.bf16 %v504_v58, %v504_v58 }
 0x203   :  { %654 = vst.msk [vmem:[#allocation2 + $0x40] sm:$0xf] %vm113_vm1, %v646_v57  ;;  %v846_v57 = vld [vmem:[%s1895_s5 + $0x18] sm:$0xff] }
 0x204   :  { %531 = vst.msk [vmem:[#allocation2 + $0x4] sm:$0xf] %vm113_vm1, %v523_v51  ;;  %883 = vmatpush.msra.mxu2 %v846_v57 }
 0x207   :  { %v566_v55 = vpop.f32.mrf.mxu2 }
 0x208   :  { %v585_v59 = vpack.c.bf16 %v566_v55, %v566_v55  ;;  %v628_v60 = vpop.f32.mrf.mxu3 }
 0x209   :  { %v647_v61 = vpack.c.bf16 %v628_v60, %v628_v60  ;;  %v507_v62 = vpop.f32.mrf.mxu1 }
 0x20a   :  { %593 = vst.msk [vmem:[#allocation2 + $0x24] sm:$0xf] %vm113_vm1, %v585_v59  ;;  %v524_v63 = vpack.c.bf16 %v507_v62, %v507_v62  ;;  %v834_v59 = vperm.slane %v1736_v42, 5 }
 0x20b   :  { %655 = vst.msk [vmem:[#allocation2 + $0x44] sm:$0xf] %vm113_vm1, %v647_v61  ;;  %v1475_v56 = vld [vmem:[#allocation2] sm:$0xff] }
 0x20c   :  { %532 = vst.msk [vmem:[#allocation2 + $0x8] sm:$0xf] %vm113_vm1, %v524_v63 }
 0x20f   :  { %v569_v0 = vpop.f32.mrf.mxu2 }
 0x210   :  { %v586_v1 = vpack.c.bf16 %v569_v0, %v569_v0  ;;  %v631_v2 = vpop.f32.mrf.mxu3 }
 0x211   :  { %v648_v3 = vpack.c.bf16 %v631_v2, %v631_v2  ;;  %v509_v4 = vpop.f32.mrf.mxu1  ;;  %v1479_v50 = vld [vmem:[#allocation2 + $0x20] sm:$0xff] }
 0x212   :  { %594 = vst.msk [vmem:[#allocation2 + $0x28] sm:$0xf] %vm113_vm1, %v586_v1  ;;  %v525_v5 = vpack.c.bf16 %v509_v4, %v509_v4  ;;  %v1483_v52 = vld [vmem:[#allocation2 + $0x40] sm:$0xff] }
 0x213   :  { %656 = vst.msk [vmem:[#allocation2 + $0x48] sm:$0xf] %vm113_vm1, %v648_v3 }
 0x214   :  { %533 = vst.msk [vmem:[#allocation2 + $0xc] sm:$0xf] %vm113_vm1, %v525_v5 }
 0x217   :  { %v571_v6 = vpop.f32.mrf.mxu2 }
 0x218   :  { %v587_v7 = vpack.c.bf16 %v571_v6, %v571_v6  ;;  %v633_v8 = vpop.f32.mrf.mxu3 }
 0x219   :  { %v649_v9 = vpack.c.bf16 %v633_v8, %v633_v8  ;;  %v512_v11 = vpop.f32.mrf.mxu1 }
 0x21a   :  { %595 = vst.msk [vmem:[#allocation2 + $0x2c] sm:$0xf] %vm113_vm1, %v587_v7  ;;  %v526_v12 = vpack.c.bf16 %v512_v11, %v512_v11 }
 0x21b   :  { %657 = vst.msk [vmem:[#allocation2 + $0x4c] sm:$0xf] %vm113_vm1, %v649_v9  ;;  %v1476_v43 = vld [vmem:[#allocation2 + $0x8] sm:$0xff] }
 0x21c   :  { %534 = vst.msk [vmem:[#allocation2 + $0x10] sm:$0xf] %vm113_vm1, %v526_v12 }
 0x21f   :  { %v574_v13 = vpop.f32.mrf.mxu2 }
 0x220   :  { %v588_v14 = vpack.c.bf16 %v574_v13, %v574_v13  ;;  %v636_v15 = vpop.f32.mrf.mxu3 }
 0x221   :  { %v650_v17 = vpack.c.bf16 %v636_v15, %v636_v15  ;;  %v514_v18 = vpop.f32.mrf.mxu1  ;;  %v1480_v48 = vld [vmem:[#allocation2 + $0x28] sm:$0xff] }
 0x222   :  { %596 = vst.msk [vmem:[#allocation2 + $0x30] sm:$0xf] %vm113_vm1, %v588_v14  ;;  %v527_v20 = vpack.c.bf16 %v514_v18, %v514_v18  ;;  %v1484_v49 = vld [vmem:[#allocation2 + $0x48] sm:$0xff] }
 0x223   :  { %658 = vst.msk [vmem:[#allocation2 + $0x50] sm:$0xf] %vm113_vm1, %v650_v17 }
 0x224   :  { %535 = vst.msk [vmem:[#allocation2 + $0x14] sm:$0xf] %vm113_vm1, %v527_v20 }
 0x227   :  { %v576_v21 = vpop.f32.mrf.mxu2 }
 0x228   :  { %v589_v23 = vpack.c.bf16 %v576_v21, %v576_v21  ;;  %v638_v24 = vpop.f32.mrf.mxu3 }
 0x229   :  { %v651_v25 = vpack.c.bf16 %v638_v24, %v638_v24  ;;  %v517_v27 = vpop.f32.mrf.mxu1 }
 0x22a   :  { %597 = vst.msk [vmem:[#allocation2 + $0x34] sm:$0xf] %vm113_vm1, %v589_v23  ;;  %v528_v28 = vpack.c.bf16 %v517_v27, %v517_v27 }
 0x22b   :  { %659 = vst.msk [vmem:[#allocation2 + $0x54] sm:$0xf] %vm113_vm1, %v651_v25  ;;  %v1477_v54 = vld [vmem:[#allocation2 + $0x10] sm:$0xff] }
 0x22c   :  { %536 = vst.msk [vmem:[#allocation2 + $0x18] sm:$0xf] %vm113_vm1, %v528_v28 }
 0x22f   :  { %v579_v30 = vpop.f32.mrf.mxu2 }
 0x230   :  { %v590_v31 = vpack.c.bf16 %v579_v30, %v579_v30  ;;  %v641_v33 = vpop.f32.mrf.mxu3 }
 0x231   :  { %v652_v34 = vpack.c.bf16 %v641_v33, %v641_v33  ;;  %v519_v36 = vpop.f32.mrf.mxu1  ;;  %v1481_v46 = vld [vmem:[#allocation2 + $0x30] sm:$0xff] }
 0x232   :  { %598 = vst.msk [vmem:[#allocation2 + $0x38] sm:$0xf] %vm113_vm1, %v590_v31  ;;  %v529_v37 = vpack.c.bf16 %v519_v36, %v519_v36  ;;  %v1485_v47 = vld [vmem:[#allocation2 + $0x50] sm:$0xff] }
 0x233   :  { %660 = vst.msk [vmem:[#allocation2 + $0x58] sm:$0xf] %vm113_vm1, %v652_v34 }
 0x234   :  { %537 = vst.msk [vmem:[#allocation2 + $0x1c] sm:$0xf] %vm113_vm1, %v529_v37 }
 0x237   :  { %v581_v38 = vpop.f32.mrf.mxu2 }
 0x238   :  { %v591_v39 = vpack.c.bf16 %v581_v38, %v581_v38  ;;  %v643_v40 = vpop.f32.mrf.mxu3 }
 0x239   :  { %v653_v41 = vpack.c.bf16 %v643_v40, %v643_v40 }
 0x23a   :  { %599 = vst.msk [vmem:[#allocation2 + $0x3c] sm:$0xf] %vm113_vm1, %v591_v39 }
 0x23b   :  { %661 = vst.msk [vmem:[#allocation2 + $0x5c] sm:$0xf] %vm113_vm1, %v653_v41  ;;  %v1478_v53 = vld [vmem:[#allocation2 + $0x18] sm:$0xff] }
 0x241   :  { %v1482_v44 = vld [vmem:[#allocation2 + $0x38] sm:$0xff] }
 0x242   :  { %v1486_v45 = vld [vmem:[#allocation2 + $0x58] sm:$0xff]  ;;  %759 = vmatpush.bf16.msra.mxu0 %v1482_v44 }
 0x243   :  { %792 = vmatpush.bf16.msra.mxu1 %v1486_v45 }
 0x246   :  { %760 = vmatpush.bf16.msra.mxu0 %v1481_v46 }
 0x247   :  { %793 = vmatpush.bf16.msra.mxu1 %v1485_v47 }
 0x24a   :  { %761 = vmatpush.bf16.msra.mxu0 %v1480_v48 }
 0x24b   :  { %794 = vmatpush.bf16.msra.mxu1 %v1484_v49 }
 0x24e   :  { %762 = vmatpush.bf16.msra.mxu0 %v1479_v50 }
 0x24f   :  { %795 = vmatpush.bf16.msra.mxu1 %v1483_v52 }
 0x252   :  { %763 = vmatpush.bf16.msra.mxu0 %v1478_v53  ;;  %1415 = vmatmul.msk.bf16.vlgmr.msra.gmra.mxu1 %vm363_vm2, %v1645_v10  ;;  %v845_v10 = vld [vmem:[%s1895_s5 + $0x10] sm:$0xff] }
 0x253   :  { %884 = vmatpush.msra.mxu2 %v845_v10 }
 0x256   :  { %764 = vmatpush.bf16.msra.mxu0 %v1477_v54 }
 0x25a   :  { %765 = vmatpush.bf16.msra.mxu0 %v1476_v43 }
 0x25e   :  { %766 = vmatpush.bf16.msra.mxu0 %v1475_v56 }
 0x261   :  { %767 = vmatmul.bf16.vlgmr.msra.gmra.mxu0 %v1655_v16  ;;  %v844_v16 = vld [vmem:[%s1895_s5 + $0x8] sm:$0xff] }
 0x262   :  { %1416 = vmatmul.msk.bf16.gmra.mxu1 %vm363_vm2, %v1664_v19  ;;  %885 = vmatpush.msra.mxu2 %v844_v16  ;;  %v843_v19 = vld [vmem:[%s1895_s5] sm:$0xff] }
 0x264   :  { %886 = vmatpush.msra.mxu2 %v843_v19 }
 0x271   :  { %772 = vmatmul.bf16.gmra.mxu0 %v1674_v22 }
 0x272   :  { %1417 = vmatmul.msk.bf16.gmra.mxu1 %vm363_vm2, %v1686_v26  ;;  %v686_v26 = vperm.slane %v1736_v42, 3 }
 0x281   :  { %777 = vmatmul.bf16.gmra.mxu0 %v1696_v29 }
 0x282   :  { %1418 = vmatmul.msk.bf16.gmra.mxu1 %vm363_vm2, %v1705_v32  ;;  %v825_v32 = vperm.slane %v1736_v42, 4 }
 0x291   :  { %782 = vmatmul.bf16.gmra.mxu0 %v1715_v35 }
 0x2cf   :  { %v797_v22 = vpop.f32.mrf.mxu1 }
 0x2d7   :  { %v799_v58 = vpop.f32.mrf.mxu1 }
 0x2de   :  { %v768_v29 = vpop.f32.mrf.mxu0 }
 0x2df   :  { %v769_v51 = vadd.f32 %v768_v29, %v686_v26  ;;  %v802_v62 = vpop.f32.mrf.mxu1 }
 0x2e1   :  { %v798_v55 = vadd.f32 %v797_v22, %v769_v51  ;;  %v1490_v22 = vld [vmem:[%s1897_s7] ss:$0 sm:$0xff] }
 0x2e3   :  { %v817_v35 = vmax.f32 %v798_v55, 0.0 }
 0x2e5   :  { %v826_v60 = vmul.f32 %v825_v32, %v817_v35 }
 0x2e6   :  { %v770_v61 = vpop.f32.mrf.mxu0 }
 0x2e7   :  { %v835_v63 = vadd.f32 %v834_v59, %v826_v60  ;;  %v771_v0 = vadd.f32 %v770_v61, %v686_v26  ;;  %v804_v7 = vpop.f32.mrf.mxu1 }
 0x2e9   :  { %v800_v1 = vadd.f32 %v799_v58, %v771_v0  ;;  %1419 = vmatmul.msk.f32.vlgmr.msra.gmra.mxu2 %vm480_vm3, %v835_v63 }
 0x2eb   :  { %v818_v2 = vmax.f32 %v800_v1, 0.0 }
 0x2ed   :  { %v827_v3 = vmul.f32 %v825_v32, %v818_v2 }
 0x2ee   :  { %v773_v4 = vpop.f32.mrf.mxu0 }
 0x2ef   :  { %v774_v5 = vadd.f32 %v773_v4, %v686_v26  ;;  %v836_v6 = vadd.f32 %v834_v59, %v827_v3  ;;  %v807_v15 = vpop.f32.mrf.mxu1 }
 0x2f1   :  { %v803_v8 = vadd.f32 %v802_v62, %v774_v5  ;;  %1420 = vmatmul.msk.f32.gmra.mxu2 %vm480_vm3, %v836_v6 }
 0x2f3   :  { %v819_v9 = vmax.f32 %v803_v8, 0.0 }
 0x2f5   :  { %v828_v11 = vmul.f32 %v825_v32, %v819_v9 }
 0x2f6   :  { %v775_v42 = vpop.f32.mrf.mxu0 }
 0x2f7   :  { %v776_v12 = vadd.f32 %v775_v42, %v686_v26  ;;  %v837_v13 = vadd.f32 %v834_v59, %v828_v11  ;;  %v809_v27 = vpop.f32.mrf.mxu1 }
 0x2f9   :  { %v805_v14 = vadd.f32 %v804_v7, %v776_v12  ;;  %1421 = vmatmul.msk.f32.gmra.mxu2 %vm480_vm3, %v837_v13 }
 0x2fb   :  { %v820_v17 = vmax.f32 %v805_v14, 0.0 }
 0x2fd   :  { %v829_v18 = vmul.f32 %v825_v32, %v820_v17  ;;  %v956_v17 = vlaneseq }
 0x2fe   :  { %v778_v20 = vpop.f32.mrf.mxu0 }
 0x2ff   :  { %v779_v21 = vadd.f32 %v778_v20, %v686_v26  ;;  %v838_v23 = vadd.f32 %v834_v59, %v829_v18  ;;  %v812_v39 = vpop.f32.mrf.mxu1  ;;  %v1839_v20 = vand.u32 127, %v956_v17 }
 0x301   :  { %v808_v24 = vadd.f32 %v807_v15, %v779_v21  ;;  %1422 = vmatmul.msk.f32.gmra.mxu2 %vm480_vm3, %v838_v23 }
 0x303   :  { %v821_v25 = vmax.f32 %v808_v24, 0.0 }
 0x305   :  { %v830_v28 = vmul.f32 %v825_v32, %v821_v25 }
 0x306   :  { %v780_v30 = vpop.f32.mrf.mxu0 }
 0x307   :  { %v781_v31 = vadd.f32 %v780_v30, %v686_v26  ;;  %v839_v33 = vadd.f32 %v834_v59, %v830_v28  ;;  %v814_v50 = vpop.f32.mrf.mxu1 }
 0x309   :  { %v810_v34 = vadd.f32 %v809_v27, %v781_v31  ;;  %1423 = vmatmul.msk.f32.gmra.mxu2 %vm480_vm3, %v839_v33 }
 0x30b   :  { %v822_v36 = vmax.f32 %v810_v34, 0.0 }
 0x30d   :  { %v831_v37 = vmul.f32 %v825_v32, %v822_v36 }
 0x30e   :  { %v783_v38 = vpop.f32.mrf.mxu0 }
 0x30f   :  { %v784_v40 = vadd.f32 %v783_v38, %v686_v26  ;;  %v840_v41 = vadd.f32 %v834_v59, %v831_v37 }
 0x311   :  { %v813_v44 = vadd.f32 %v812_v39, %v784_v40  ;;  %1424 = vmatmul.msk.f32.gmra.mxu2 %vm480_vm3, %v840_v41 }
 0x313   :  { %v823_v45 = vmax.f32 %v813_v44, 0.0 }
 0x315   :  { %v832_v46 = vmul.f32 %v825_v32, %v823_v45 }
 0x316   :  { %v785_v47 = vpop.f32.mrf.mxu0 }
 0x317   :  { %v786_v48 = vadd.f32 %v785_v47, %v686_v26  ;;  %v841_v49 = vadd.f32 %v834_v59, %v832_v46 }
 0x319   :  { %v815_v52 = vadd.f32 %v814_v50, %v786_v48  ;;  %1425 = vmatmul.msk.f32.gmra.mxu2 %vm480_vm3, %v841_v49 }
 0x31b   :  { %v824_v53 = vmax.f32 %v815_v52, 0.0 }
 0x31d   :  { %v833_v54 = vmul.f32 %v825_v32, %v824_v53 }
 0x31f   :  { %v842_v43 = vadd.f32 %v834_v59, %v833_v54 }
 0x321   :  { %1426 = vmatmul.msk.f32.gmra.mxu2 %vm480_vm3, %v842_v43  ;;  %1130 = vmatpush.msra.mxu3 %v842_v43 }
 0x323   :  { %1131 = vmatpush.msra.mxu3 %v841_v49 }
 0x325   :  { %1132 = vmatpush.msra.mxu3 %v840_v41 }
 0x327   :  { %1133 = vmatpush.msra.mxu3 %v839_v33 }
 0x329   :  { %1134 = vmatpush.msra.mxu3 %v838_v23 }
 0x32b   :  { %1135 = vmatpush.msra.mxu3 %v837_v13 }
 0x32d   :  { %1136 = vmatpush.msra.mxu3 %v836_v6 }
 0x32f   :  { %1137 = vmatpush.msra.mxu3 %v835_v63 }
 0x36c   :  { %v888_v56 = vpop.f32.mrf.mxu2 }
 0x36d   :  { %v913_v1 = vmul.f32 2.0, %v888_v56 }
 0x36f   :  { %v1832_v5 = vsub.f32 %v1490_v22, %v913_v1 }
 0x371   :  { %v932_v8 = vsel %vm63_vm0, %v1832_v5, inf }
 0x374   :  { %v891_v57 = vpop.f32.mrf.mxu2 }
 0x375   :  { %v914_v42 = vmul.f32 2.0, %v891_v57 }
 0x377   :  { %v925_v13 = vsub.f32 %v1490_v22, %v914_v42 }
 0x379   :  { %v935_v14 = vsel %vm63_vm0, %v925_v13, inf }
 0x37c   :  { %v894_v10 = vpop.f32.mrf.mxu2 }
 0x37d   :  { %v915_v58 = vmul.f32 2.0, %v894_v10 }
 0x37f   :  { %v926_v55 = vsub.f32 %v1490_v22, %v915_v58 }
 0x381   :  { %v938_v32 = vsel %vm63_vm0, %v926_v55, inf }
 0x384   :  { %v897_v16 = vpop.f32.mrf.mxu2 }
 0x385   :  { %v916_v19 = vmul.f32 2.0, %v897_v16 }
 0x387   :  { %v1825_v26 = vsub.f32 %v1490_v22, %v916_v19 }
 0x389   :  { %v941_v29 = vsel %vm63_vm0, %v1825_v26, inf }
 0x38a   :  { %942 = vmin.xlane.f32.xlu2 %v941_v29 }
 0x38c   :  { %v900_v51 = vpop.f32.mrf.mxu2 }
 0x38d   :  { %v917_v61 = vmul.f32 2.0, %v900_v51 }
 0x38f   :  { %v928_v0 = vsub.f32 %v1490_v22, %v917_v61 }
 0x391   :  { %v944_v2 = vsel %vm63_vm0, %v928_v0, inf }
 0x392   :  { %939 = vmin.xlane.f32.xlu2 %v938_v32 }
 0x394   :  { %v903_v35 = vpop.f32.mrf.mxu2 }
 0x395   :  { %v918_v59 = vmul.f32 2.0, %v903_v35 }
 0x397   :  { %v929_v60 = vsub.f32 %v1490_v22, %v918_v59 }
 0x399   :  { %v947_v62 = vsel %vm63_vm0, %v929_v60, inf }
 0x39a   :  { %948 = vmin.xlane.f32.xlu1 %v947_v62 }
 0x39c   :  { %v906_v63 = vpop.f32.mrf.mxu2 }
 0x39d   :  { %v919_v7 = vmul.f32 2.0, %v906_v63 }
 0x39f   :  { %v930_v11 = vsub.f32 %v1490_v22, %v919_v7 }
 0x3a1   :  { %v950_v12 = vsel %vm63_vm0, %v930_v11, inf }
 0x3a2   :  { %945 = vmin.xlane.f32.xlu1 %v944_v2 }
 0x3a4   :  { %v909_v3 = vpop.f32.mrf.mxu2 }
 0x3a5   :  { %v920_v4 = vmul.f32 2.0, %v909_v3 }
 0x3a7   :  { %v931_v6 = vsub.f32 %v1490_v22, %v920_v4 }
 0x3a9   :  { %v953_v9 = vsel %vm63_vm0, %v931_v6, inf }
 0x3aa   :  { %933 = vmin.xlane.f32.xlu1 %v932_v8  ;;  %954 = vmin.xlane.f32.xlu0 %v953_v9 }
 0x3b2   :  { %951 = vmin.xlane.f32.xlu0 %v950_v12 }
 0x3ba   :  { %936 = vmin.xlane.f32.xlu0 %v935_v14 }
 0x3fd   :  { %v943_v15 = vpop.xlane.xlu2 %942 }
 0x3fe   :  { %vm961_vm8 = vcmp.le.f32.partialorder %v1825_v26, %v943_v15 }
 0x3ff   :  { %v969_v49 = vsel %vm961_vm8, %v1839_v20, 16 }
 0x400   :  { %v1019_v43 = vsel %vm63_vm0, %v969_v49, 2147483647 }
 0x401   :  { %v1021_v10 = vshra.s32 %v1019_v43, 16  ;;  %v1020_v14 = vand.u32 65535, %v1019_v43 }
 0x403   :  { %v1023_v26 = vcvt.s32.f32 %v1021_v10 }
 0x405   :  { %v940_v18 = vpop.xlane.xlu2 %939 }
 0x406   :  { %vm960_vm4 = vcmp.le.f32.partialorder %v926_v55, %v940_v18 }
 0x407   :  { %v968_v25 = vsel %vm960_vm4, %v1839_v20, 16 }
 0x408   :  { %v1004_v30 = vsel %vm63_vm0, %v968_v25, 2147483647 }
 0x409   :  { %v1006_v31 = vshra.s32 %v1004_v30, 16  ;;  %v1005_v61 = vand.u32 65535, %v1004_v30 }
 0x40b   :  { %v1008_v34 = vcvt.s32.f32 %v1006_v31  ;;  %v1007_v63 = vcvt.s32.f32 %v1005_v61  ;;  %v1118_v31 = vld [vmem:[%s1898_s8] sm:$0x3] }
 0x40c   :  { %1435 = vmatmul.msk.f32.vlgmr.msra.gmra.mxu3 %vm363_vm2, %v1118_v31 }
 0x40d   :  { %v949_v21 = vpop.xlane.xlu1 %948 }
 0x40e   :  { %vm963_vm5 = vcmp.le.f32.partialorder %v929_v60, %v949_v21  ;;  %v1022_v21 = vcvt.s32.f32 %v1020_v14 }
 0x40f   :  { %v971_v23 = vsel %vm963_vm5, %v1839_v20, 16 }
 0x410   :  { %v1049_v24 = vsel %vm63_vm0, %v971_v23, 2147483647 }
 0x411   :  { %v1051_v27 = vshra.s32 %v1049_v24, 16  ;;  %v1050_v32 = vand.u32 65535, %v1049_v24 }
 0x413   :  { %v1053_v28 = vcvt.s32.f32 %v1051_v27  ;;  %v1052_v59 = vcvt.s32.f32 %v1050_v32 }
 0x415   :  { %1054 = vmin.xlane.f32.xlu1 %v1053_v28  ;;  %v946_v33 = vpop.xlane.xlu1 %945 }
 0x416   :  { %vm962_vm6 = vcmp.le.f32.partialorder %v928_v0, %v946_v33 }
 0x417   :  { %v970_v39 = vsel %vm962_vm6, %v1839_v20, 16 }
 0x418   :  { %v1034_v44 = vsel %vm63_vm0, %v970_v39, 2147483647 }
 0x419   :  { %v1036_v47 = vshra.s32 %v1034_v44, 16 }
 0x41b   :  { %v1038_v53 = vcvt.s32.f32 %v1036_v47 }
 0x41d   :  { %1009 = vmin.xlane.f32.xlu1 %v1008_v34  ;;  %v955_v36 = vpop.xlane.xlu0 %954  ;;  %v934_v52 = vpop.xlane.xlu1 %933 }
 0x41e   :  { %vm965_vm7 = vcmp.le.f32.partialorder %v931_v6, %v955_v36  ;;  %vm958_vm10 = vcmp.le.f32.partialorder %v1832_v5, %v934_v52  ;;  %v1035_v5 = vand.u32 65535, %v1034_v44  ;;  %v1517_v44 = vmov 1.0  }
 0x41f   :  { %v973_v37 = vsel %vm965_vm7, %v1839_v20, 16  ;;  %v966_v19 = vsel %vm958_vm10, %v1839_v20, 16 }
 0x420   :  { %v1079_v38 = vsel %vm63_vm0, %v973_v37, 2147483647  ;;  %v974_v29 = vsel %vm63_vm0, %v966_v19, 2147483647  ;;  %v1037_v9 = vcvt.s32.f32 %v1035_v5  ;;  %v1162_v5 = vld [vmem:[%s1896_s6] sm:$0xff] }
 0x421   :  { %v1081_v40 = vshra.s32 %v1079_v38, 16  ;;  %v976_v51 = vshra.s32 %v974_v29, 16  ;;  %v1080_v1 = vand.u32 65535, %v1079_v38  ;;  %v975_v25 = vand.u32 65535, %v974_v29 }
 0x423   :  { %v1083_v41 = vcvt.s32.f32 %v1081_v40  ;;  %v978_v55 = vcvt.s32.f32 %v976_v51  ;;  %v1082_v3 = vcvt.s32.f32 %v1080_v1 }
 0x425   :  { %1084 = vmin.xlane.f32.xlu2 %v1083_v41  ;;  %v952_v45 = vpop.xlane.xlu0 %951 }
 0x426   :  { %vm964_vm9 = vcmp.le.f32.partialorder %v930_v11, %v952_v45 }
 0x427   :  { %v972_v46 = vsel %vm964_vm9, %v1839_v20, 16 }
 0x428   :  { %v1064_v48 = vsel %vm63_vm0, %v972_v46, 2147483647 }
 0x429   :  { %v1066_v50 = vshra.s32 %v1064_v48, 16  ;;  %v1065_v6 = vand.u32 65535, %v1064_v48 }
 0x42b   :  { %v1068_v54 = vcvt.s32.f32 %v1066_v50  ;;  %v1067_v11 = vcvt.s32.f32 %v1065_v6 }
 0x42d   :  { %1039 = vmin.xlane.f32.xlu2 %v1038_v53  ;;  %1069 = vmin.xlane.f32.xlu0 %v1068_v54  ;;  %v937_v56 = vpop.xlane.xlu0 %936 }
 0x42e   :  { %vm959_vm11 = vcmp.le.f32.partialorder %v925_v13, %v937_v56 }
 0x42f   :  { %v967_v57 = vsel %vm959_vm11, %v1839_v20, 16 }
 0x430   :  { %v989_v16 = vsel %vm63_vm0, %v967_v57, 2147483647 }
 0x431   :  { %v991_v22 = vshra.s32 %v989_v16, 16  ;;  %v990_v13 = vand.u32 65535, %v989_v16 }
 0x433   :  { %v993_v58 = vcvt.s32.f32 %v991_v22  ;;  %v992_v18 = vcvt.s32.f32 %v990_v13 }
 0x435   :  { %1024 = vmin.xlane.f32.xlu0 %v1023_v26  ;;  %994 = vmin.xlane.f32.xlu2 %v993_v58 }
 0x43d   :  { %979 = vmin.xlane.f32.xlu0 %v978_v55 }
 0x488   :  { %v1859_v35 = vpop.xlane.xlu1 %1054 }
 0x489   :  { %vm1056_vm12 = vcmp.eq.f32.partialorder %v1053_v28, %v1859_v35  ;;  %v977_v28 = vcvt.s32.f32 %v975_v25  ;;  %v1061_v40 = vcvt.f32.s32 %v1859_v35 }
 0x48a   :  { %v1057_v60 = vsel %vm1056_vm12, %v1052_v59, inf }
 0x48b   :  { %1058 = vmin.xlane.f32.xlu0 %v1057_v60  ;;  %v1062_v49 = vshll.u32 %v1061_v40, 16 }
 0x48f   :  { %v1139_v6 = vpop.f32.mrf.mxu3 }
 0x490   :  { %v1862_v62 = vpop.xlane.xlu1 %1009 }
 0x491   :  { %vm1011_vm13 = vcmp.eq.f32.partialorder %v1008_v34, %v1862_v62  ;;  %v1016_v57 = vcvt.f32.s32 %v1862_v62 }
 0x492   :  { %v1012_v0 = vsel %vm1011_vm13, %v1007_v63, inf }
 0x493   :  { %1013 = vmin.xlane.f32.xlu0 %v1012_v0 }
 0x498   :  { %v1085_v2 = vpop.xlane.xlu2 %1084 }
 0x499   :  { %vm1086_vm14 = vcmp.eq.f32.partialorder %v1083_v41, %v1085_v2  ;;  %v1091_v33 = vcvt.f32.s32 %v1085_v2 }
 0x49a   :  { %v1087_v4 = vsel %vm1086_vm14, %v1082_v3, inf  ;;  %vm1187_vm14 = vcmask 254976  }
 0x49b   :  { %1088 = vmin.xlane.f32.xlu1 %v1087_v4  ;;  %v1092_v36 = vshll.u32 %v1091_v33, 16  ;;  %v1163_v4 = vld [vmem:[%s1896_s6 + $0x8] sm:$0xff]  ;;  %1188 = vst.msk [vmem:[#allocation3] sm:$0x3] %vm1187_vm14, %v1139_v6 }
 0x4a0   :  { %v1040_v7 = vpop.xlane.xlu2 %1039  ;;  %v1070_v8 = vpop.xlane.xlu0 %1069 }
 0x4a1   :  { %vm1041_vm15 = vcmp.eq.f32.partialorder %v1038_v53, %v1040_v7  ;;  %vm1071_vm1 = vcmp.eq.f32.partialorder %v1068_v54, %v1070_v8  ;;  %v1076_v41 = vcvt.f32.s32 %v1070_v8  ;;  %v1046_v45 = vcvt.f32.s32 %v1040_v7 }
 0x4a2   :  { %v1042_v42 = vsel %vm1041_vm15, %v1037_v9, inf  ;;  %v1072_v12 = vsel %vm1071_vm1, %v1067_v11, inf }
 0x4a3   :  { %1043 = vmin.xlane.f32.xlu1 %v1042_v42  ;;  %1073 = vmin.xlane.f32.xlu2 %v1072_v12  ;;  %v1077_v50 = vshll.u32 %v1076_v41, 16  ;;  %v1047_v54 = vshll.u32 %v1046_v45, 16 }
 0x4a8   :  { %v995_v15 = vpop.xlane.xlu2 %994  ;;  %v1025_v17 = vpop.xlane.xlu0 %1024 }
 0x4a9   :  { %vm996_vm3 = vcmp.eq.f32.partialorder %v993_v58, %v995_v15  ;;  %vm1026_vm4 = vcmp.eq.f32.partialorder %v1023_v26, %v1025_v17  ;;  %v1031_v16 = vcvt.f32.s32 %v1025_v17  ;;  %v1001_v22 = vcvt.f32.s32 %v995_v15 }
 0x4aa   :  { %v997_v23 = vsel %vm996_vm3, %v992_v18, inf  ;;  %v1027_v24 = vsel %vm1026_vm4, %v1022_v21, inf  ;;  %v1017_v58 = vshll.u32 %v1016_v57, 16 }
 0x4ab   :  { %998 = vmin.xlane.f32.xlu1 %v997_v23  ;;  %1028 = vmin.xlane.f32.xlu2 %v1027_v24  ;;  %v1002_v59 = vshll.u32 %v1001_v22, 16 }
 0x4b0   :  { %v980_v27 = vpop.xlane.xlu0 %979 }
 0x4b1   :  { %vm981_vm5 = vcmp.eq.f32.partialorder %v978_v55, %v980_v27  ;;  %v1032_v55 = vshll.u32 %v1031_v16, 16  ;;  %v986_v62 = vcvt.f32.s32 %v980_v27 }
 0x4b2   :  { %v982_v30 = vsel %vm981_vm5, %v977_v28, inf }
 0x4b3   :  { %983 = vmin.xlane.f32.xlu2 %v982_v30  ;;  %v987_v1 = vshll.u32 %v986_v62, 16 }
 0x4fe   :  { %v1059_v38 = vpop.xlane.xlu0 %1058 }
 0x4ff   :  { %v1060_v46 = vcvt.f32.s32 %v1059_v38 }
 0x501   :  { %v1063_v43 = vadd.s32 %v1062_v49, %v1060_v46 }
 0x503   :  { %vm1099_vm8 = vcmp.eq.s32.totalorder %v1839_v20, %v1063_v43 }
 0x506   :  { %v1014_v10 = vpop.xlane.xlu0 %1013 }
 0x507   :  { %v1015_v26 = vcvt.f32.s32 %v1014_v10 }
 0x509   :  { %v1018_v60 = vadd.s32 %v1017_v58, %v1015_v26 }
 0x50b   :  { %vm1096_vm11 = vcmp.eq.s32.totalorder %v1839_v20, %v1018_v60 }
 0x50e   :  { %v1089_v34 = vpop.xlane.xlu1 %1088 }
 0x50f   :  { %v1090_v37 = vcvt.f32.s32 %v1089_v34 }
 0x511   :  { %v1093_v39 = vadd.s32 %v1092_v36, %v1090_v37 }
 0x513   :  { %vm1101_vm6 = vcmp.eq.s32.totalorder %v1839_v20, %v1093_v39 }
 0x514   :  { %1436 = vmatpush.msk.msrb.mxu3 %vm1101_vm6, %v1517_v44 }
 0x516   :  { %v1044_v47 = vpop.xlane.xlu1 %1043  ;;  %v1074_v48 = vpop.xlane.xlu2 %1073 }
 0x517   :  { %v1045_v52 = vcvt.f32.s32 %v1044_v47  ;;  %v1075_v53 = vcvt.f32.s32 %v1074_v48 }
 0x519   :  { %v1078_v56 = vadd.s32 %v1077_v50, %v1075_v53  ;;  %v1048_v19 = vadd.s32 %v1047_v54, %v1045_v52 }
 0x51b   :  { %vm1100_vm7 = vcmp.eq.s32.totalorder %v1839_v20, %v1078_v56  ;;  %vm1098_vm9 = vcmp.eq.s32.totalorder %v1839_v20, %v1048_v19 }
 0x51c   :  { %1437 = vmatpush.msk.msrb.mxu3 %vm1100_vm7, %v1517_v44 }
 0x51e   :  { %v999_v29 = vpop.xlane.xlu1 %998  ;;  %v1029_v51 = vpop.xlane.xlu2 %1028  ;;  %1438 = vmatpush.msk.msrb.mxu3 %vm1099_vm8, %v1517_v44 }
 0x51f   :  { %v1000_v32 = vcvt.f32.s32 %v999_v29  ;;  %v1030_v35 = vcvt.f32.s32 %v1029_v51 }
 0x520   :  { %1439 = vmatpush.msk.msrb.mxu3 %vm1098_vm9, %v1517_v44 }
 0x521   :  { %v1033_v61 = vadd.s32 %v1032_v55, %v1030_v35  ;;  %v1003_v63 = vadd.s32 %v1002_v59, %v1000_v32 }
 0x523   :  { %vm1097_vm10 = vcmp.eq.s32.totalorder %v1839_v20, %v1033_v61  ;;  %vm1095_vm12 = vcmp.eq.s32.totalorder %v1839_v20, %v1003_v63 }
 0x524   :  { %1440 = vmatpush.msk.msrb.mxu3 %vm1097_vm10, %v1517_v44 }
 0x526   :  { %v984_v0 = vpop.xlane.xlu2 %983  ;;  %1441 = vmatpush.msk.msrb.mxu3 %vm1096_vm11, %v1517_v44 }
 0x527   :  { %v985_v2 = vcvt.f32.s32 %v984_v0 }
 0x528   :  { %1442 = vmatpush.msk.msrb.mxu3 %vm1095_vm12, %v1517_v44 }
 0x529   :  { %v988_v3 = vadd.s32 %v987_v1, %v985_v2 }
 0x52b   :  { %vm1094_vm13 = vcmp.eq.s32.totalorder %v1839_v20, %v988_v3 }
 0x52c   :  { %1443 = vmatpush.msk.msrb.mxu3 %vm1094_vm13, %v1517_v44 }
 0x52d   :  { %1444 = vmatmul.msk.f32.vlgmr.msrb.gmra.mxu3 %vm363_vm2, %v1118_v31  ;;  %vm1193_vm2 = vcmask 517376  }
 0x52e   :  { %1181 = vmatpush.msra.mxu3 %v1163_v4 }
 0x530   :  { %1182 = vmatpush.msra.mxu3 %v1162_v5 }
 0x5b0   :  { %v1159_v7 = vpop.f32.mrf.mxu3 }
 0x5b1   :  { %1445 = vmatmul.msk.f32.vlgmr.msra.gmra.mxu3 %vm63_vm0, %v1159_v7 }
 0x634   :  { %v1184_v20 = vpop.f32.mrf.mxu3 }
 0x635   :  { %1190 = vrot.lane.b32.xlu0 %v1184_v20, %s1518_s18 }
 0x6a7   :  { %v1191_v8 = vpop.permute.xlu0 %1190 }
 0x6a8   :  { %1194 = vst.msk [vmem:[#allocation3] sm:$0x3] %vm1193_vm2, %v1191_v8 }
 0x6a9   :  { %1205 = dma.vmem_to_hbm [thread:$0]  %s1201_s20, 32, %s1203_s2, [#allocation4]  }
 0x6aa   :  { %1515 = dma.done.wait [#allocation4], 32  }
 0x6ab   :  { %1516 = vsyncadd [#allocation4], 4294967264 }
 0x6ac   :  { %1210 = vsyncpa [#allocation4], 1 }

</bundles_post_ra>
